<compile_context>
chip_gen: v6e
topology: v6e:2x2x1
jax: 0.10.0
libtpu: 0.0.40
codegen_flags: <defaults>
</compile_context>

<pallas_src>
import jax
import jax.numpy as jnp
from jax.experimental import pallas as pl
from jax.experimental.pallas import tpu as pltpu

BN_EPS = 1e-5


def _head_kernel(x_ref, scale_ref, shift_ref, wt_ref,
                 gfeat_ref, feat_ref, score_ref, acc_ref):
    # One (batch-tile b, channel-chunk c) grid step.
    #   x_ref:     (tb, HW, tc)  channels-last activation block (tc lane-dense)
    #   scale_ref: (1, tc)       folded BN scale chunk
    #   shift_ref: (1, tc)       folded BN shift chunk
    #   wt_ref:    (tc, ncp)     classifier weight chunk (transposed, bf16)
    #   gfeat_ref: (tb, tc)      global-average-pooled features (out)
    #   feat_ref:  (tb, tc)      BNNeck features (out)
    #   score_ref: (tb, ncp)     classifier logits (out, revisited across c)
    #   acc_ref:   (tb, ncp)     f32 matmul accumulator (scratch)
    c = pl.program_id(1)

    x = x_ref[...].astype(jnp.float32)              # f32 accumulation (bf16-safe)
    inv_hw = 1.0 / x.shape[1]                       # HW block == full spatial extent
    gfeat = jnp.sum(x, axis=1) * inv_hw             # (tb, tc) sublane-direction pool
    gfeat_ref[...] = gfeat

    # folded BatchNorm1d (eval running stats): feat = gfeat * scale + shift
    feat = gfeat * scale_ref[...] + shift_ref[...]
    feat_ref[...] = feat

    # classifier partial product for this channel chunk (bf16 MXU, f32 accumulate)
    partial = jnp.dot(feat.astype(wt_ref.dtype), wt_ref[...],
                      preferred_element_type=jnp.float32)

    @pl.when(c == 0)
    def _():
        acc_ref[...] = jnp.zeros_like(acc_ref)

    acc_ref[...] += partial

    @pl.when(c == pl.num_programs(1) - 1)
    def _():
        score_ref[...] = acc_ref[...]


def _pick_channel_tile(C):
    for tc in (512, 256, 128):
        if C % tc == 0:
            return tc
    return C  # odd C: single chunk (block == full dim, always legal)


def _vmem_capacity_bytes():
    try:
        return int(pltpu.get_tpu_info().vmem_capacity_bytes)
    except Exception:
        return 64 * 1024 * 1024  # conservative: v7x per-TensorCore physical VMEM


def prepare_classifier_weight(cls_weight, num_classes_padded):
    """Transpose + pad + bf16-cast the classifier weight once (hoist out of the
    per-batch forward and pass via `cls_weight_t_padded=`)."""
    wt = jnp.transpose(cls_weight).astype(jnp.bfloat16)   # (C, num_classes)
    nc = wt.shape[1]
    if num_classes_padded != nc:
        wt = jnp.pad(wt, ((0, 0), (0, num_classes_padded - nc)))
    return wt


def mix_cnn_head(x_nhwc, bn_gamma, bn_beta, bn_rmean, bn_rvar, cls_weight,
                 *, batch_tile=None, cls_weight_t_padded=None):
    """x_nhwc: (B, H, W, C) backbone output, channels-last (f32 or bf16 — feed the
    backbone's bf16 output directly for half the HBM traffic).
    cls_weight: (num_classes, C) as in nn.Linear.  Returns (global_feat, feat, cls_score)."""
    B, H, W, C = x_nhwc.shape
    HW = H * W
    num_classes = cls_weight.shape[0]
    nc_pad = ((num_classes + 127) // 128) * 128          # lane-dense classifier output

    # layout plumbing only: collapse spatial dims (metadata-only reshape, no copy)
    x = x_nhwc.reshape(B, HW, C)

    # fold eval-mode BN into scale/shift (two C-length vectors)
    scale1d = (bn_gamma * jax.lax.rsqrt(bn_rvar + BN_EPS)).astype(jnp.float32)
    shift1d = (bn_beta - bn_rmean * scale1d).astype(jnp.float32)
    scale = scale1d.reshape(1, C)
    shift = shift1d.reshape(1, C)

    # classifier weight: (C, nc_pad) bf16 (ideally pre-laid-out by the caller)
    if cls_weight_t_padded is None:
        wt = prepare_classifier_weight(cls_weight, nc_pad)
    else:
        wt = cls_weight_t_padded
        assert wt.shape == (C, nc_pad)

    tc = _pick_channel_tile(C)
    n_c = pl.cdiv(C, tc)

    # --- VMEM budget (per-generation) and batch tile -------------------------
    vmem_cap = _vmem_capacity_bytes()                      # 64 MiB v7x, 128 MiB v5e/v6e
    vmem_limit = min(int(vmem_cap * 0.6), 64 * 1024 * 1024)
    budget = vmem_limit - 4 * 1024 * 1024                  # headroom for Mosaic scratch

    if batch_tile is None:
        x_itemsize = jnp.dtype(x.dtype).itemsize
        per_sample_x = HW * tc * x_itemsize                # lane-dense: no hidden padding
        per_b = (2 * per_sample_x                          # x block, double-buffered
                 + 16 * tc                                 # gfeat + feat out (f32, x2 bufs)
                 + 12 * nc_pad)                            # score out (x2 bufs) + f32 acc
        fixed = 2 * tc * nc_pad * 2 + 8 * tc               # bf16 weight chunk (x2) + BN vecs
        avail = max(budget - fixed, per_b)
        tb = int(avail // per_b)
        # diminishing returns past ~8 MiB per x buffer; keep pipeline granular
        tb = min(tb, max(1, (8 * 1024 * 1024) // per_sample_x))
        tb = max(tb, 1)
        if tb >= B:
            tb = B
        else:
            tb = max(8, (tb // 8) * 8)                     # keep output sublanes aligned
    else:
        tb = batch_tile

    grid = (pl.cdiv(B, tb), n_c)

    global_feat, feat, score_pad = pl.pallas_call(
        _head_kernel,
        out_shape=(
            jax.ShapeDtypeStruct((B, C), jnp.float32),        # global_feat
            jax.ShapeDtypeStruct((B, C), jnp.float32),        # feat (bnneck)
            jax.ShapeDtypeStruct((B, nc_pad), jnp.float32),   # cls_score (padded)
        ),
        grid=grid,
        in_specs=[
            pl.BlockSpec((tb, HW, tc), lambda b, c: (b, 0, c)),   # activation tile
            pl.BlockSpec((1, tc), lambda b, c: (0, c)),           # BN scale chunk
            pl.BlockSpec((1, tc), lambda b, c: (0, c)),           # BN shift chunk
            pl.BlockSpec((tc, nc_pad), lambda b, c: (c, 0)),      # classifier W^T chunk
        ],
        out_specs=(
            pl.BlockSpec((tb, tc), lambda b, c: (b, c)),
            pl.BlockSpec((tb, tc), lambda b, c: (b, c)),
            pl.BlockSpec((tb, nc_pad), lambda b, c: (b, 0)),      # revisited across c
        ),
        scratch_shapes=[pltpu.VMEM((tb, nc_pad), jnp.float32)],   # matmul accumulator
        compiler_params=pltpu.CompilerParams(
            dimension_semantics=("parallel", "arbitrary"),        # megacore on v7x
            vmem_limit_bytes=vmem_limit,
        ),
    )(x, scale, shift, wt)

    cls_score = score_pad[:, :num_classes]
    return global_feat, feat, cls_score


if __name__ == "__main__":
    key = jax.random.PRNGKey(0)
    k_x, k_w = jax.random.split(key)

    B, C, H, W = 2, 2048, 8, 8       # in_planes = 2048 per module __init__
    num_classes = 16

    # synthetic backbone output (stands in for self.base(x, domains)), channels-last
    x = jax.random.normal(k_x, (B, H, W, C), dtype=jnp.float32)

    # deterministic parameter init matching the module's __init__:
    #  - bottleneck BatchNorm1d: weight=1, bias=0 (weights_init_kaiming),
    #    running_mean=0, running_var=1 (PyTorch defaults)
    #  - classifier Linear: normal(std=0.001), no bias (weights_init_classifier)
    bn_gamma = jnp.ones((C,), jnp.float32)
    bn_beta = jnp.zeros((C,), jnp.float32)
    bn_rmean = jnp.zeros((C,), jnp.float32)
    bn_rvar = jnp.ones((C,), jnp.float32)
    cls_weight = 0.001 * jax.random.normal(k_w, (num_classes, C), jnp.float32)

    global_feat, feat, cls_score = mix_cnn_head(
        x, bn_gamma, bn_beta, bn_rmean, bn_rvar, cls_weight)
    jax.block_until_ready((global_feat, feat, cls_score))

    # sanity check against a plain-JAX reference
    gf_ref = jnp.mean(x, axis=(1, 2))
    feat_ref = (gf_ref - bn_rmean) * jax.lax.rsqrt(bn_rvar + BN_EPS) * bn_gamma + bn_beta
    score_ref = feat_ref @ cls_weight.T
    assert jnp.allclose(global_feat, gf_ref, atol=1e-4), "global_feat mismatch"
    assert jnp.allclose(feat, feat_ref, atol=1e-4), "feat mismatch"
    # classifier runs on bf16 operands (f32 accumulate) -> relaxed tolerance
    assert jnp.allclose(cls_score, score_ref, atol=2e-3, rtol=2e-2), "cls_score mismatch"

    print("KERNEL_OK")
</pallas_src>

<mosaic_0001>
module attributes {stable_mosaic.version = 11 : i64} {
  func.func @_head_kernel(%arg0: i32, %arg1: i32, %arg2: memref<2x64x512xf32, #tpu.memory_space<vmem>>, %arg3: memref<1x512xf32, #tpu.memory_space<vmem>>, %arg4: memref<1x512xf32, #tpu.memory_space<vmem>>, %arg5: memref<512x128xbf16, #tpu.memory_space<vmem>>, %arg6: memref<2x512xf32, #tpu.memory_space<vmem>>, %arg7: memref<2x512xf32, #tpu.memory_space<vmem>>, %arg8: memref<2x128xf32, #tpu.memory_space<vmem>>, %arg9: memref<2x128xf32, #tpu.memory_space<vmem>>) attributes {dimension_semantics = [#tpu.dimension_semantics<parallel>, #tpu.dimension_semantics<arbitrary>], iteration_bounds = array<i64: 1, 4>, scalar_prefetch = 0 : i64, scratch_operands = 1 : i64, tpu.core_type = #tpu.core_type<tc>, window_params = [{transform_indices = @transform_0, window_bounds = array<i64: 2, 64, 512>}, {transform_indices = @transform_1, window_bounds = array<i64: 1, 512>}, {transform_indices = @transform_2, window_bounds = array<i64: 1, 512>}, {transform_indices = @transform_3, window_bounds = array<i64: 512, 128>}, {transform_indices = @transform_4, window_bounds = array<i64: 2, 512>}, {transform_indices = @transform_5, window_bounds = array<i64: 2, 512>}, {transform_indices = @transform_6, window_bounds = array<i64: 2, 128>}]} {
    %c0 = arith.constant 0 : index
    %c0_0 = arith.constant 0 : index
    %c0_1 = arith.constant 0 : index
    %0 = vector.load %arg2[%c0, %c0_0, %c0_1] : memref<2x64x512xf32, #tpu.memory_space<vmem>>, vector<2x64x512xf32>
    %cst = arith.constant dense<0.000000e+00> : vector<2x512xf32>
    %1 = vector.multi_reduction <add>, %0, %cst [1] : vector<2x64x512xf32> to vector<2x512xf32>
    %cst_2 = arith.constant 1.562500e-02 : f32
    %2 = vector.broadcast %cst_2 : f32 to vector<2x512xf32>
    %3 = arith.mulf %1, %2 : vector<2x512xf32>
    %c0_3 = arith.constant 0 : index
    %c0_4 = arith.constant 0 : index
    %4 = vector.load %arg6[%c0_3, %c0_4] : memref<2x512xf32, #tpu.memory_space<vmem>>, vector<2x512xf32>
    tpu.vector_store %arg6[%c0_3, %c0_4], %3 {strides = array<i32>} : memref<2x512xf32, #tpu.memory_space<vmem>>, vector<2x512xf32>,
    %c0_5 = arith.constant 0 : index
    %c0_6 = arith.constant 0 : index
    %5 = vector.load %arg3[%c0_5, %c0_6] : memref<1x512xf32, #tpu.memory_space<vmem>>, vector<1x512xf32>
    %6 = vector.broadcast %5 : vector<1x512xf32> to vector<2x512xf32>
    %7 = arith.mulf %3, %6 : vector<2x512xf32>
    %c0_7 = arith.constant 0 : index
    %c0_8 = arith.constant 0 : index
    %8 = vector.load %arg4[%c0_7, %c0_8] : memref<1x512xf32, #tpu.memory_space<vmem>>, vector<1x512xf32>
    %9 = vector.broadcast %8 : vector<1x512xf32> to vector<2x512xf32>
    %10 = arith.addf %7, %9 : vector<2x512xf32>
    %c0_9 = arith.constant 0 : index
    %c0_10 = arith.constant 0 : index
    %11 = vector.load %arg7[%c0_9, %c0_10] : memref<2x512xf32, #tpu.memory_space<vmem>>, vector<2x512xf32>
    tpu.vector_store %arg7[%c0_9, %c0_10], %10 {strides = array<i32>} : memref<2x512xf32, #tpu.memory_space<vmem>>, vector<2x512xf32>,
    %12 = arith.truncf %10 : vector<2x512xf32> to vector<2x512xbf16>
    %c0_11 = arith.constant 0 : index
    %c0_12 = arith.constant 0 : index
    %13 = vector.load %arg5[%c0_11, %c0_12] : memref<512x128xbf16, #tpu.memory_space<vmem>>, vector<512x128xbf16>
    %cst_13 = arith.constant dense<0.000000e+00> : vector<2x128xf32>
    %14 = tpu.matmul %12, %13, %cst_13 {dimension_numbers = #tpu.dot_dimension_numbers<[1], [0], [0], [1], [0, 0, 1, 1], [], []>} : vector<2x512xbf16>, vector<512x128xbf16>, vector<2x128xf32> -> vector<2x128xf32>
    %c0_i32 = arith.constant 0 : i32
    %15 = arith.cmpi eq, %arg1, %c0_i32 : i32
    %16 = arith.extui %15 : i1 to i32
    %c0_i32_14 = arith.constant 0 : i32
    %17 = arith.cmpi ne, %16, %c0_i32_14 : i32
    scf.if %17 {
      %cst_20 = arith.constant 0.000000e+00 : f32
      %24 = vector.broadcast %cst_20 : f32 to vector<2x128xf32>
      %c0_21 = arith.constant 0 : index
      %c0_22 = arith.constant 0 : index
      %25 = vector.load %arg9[%c0_21, %c0_22] : memref<2x128xf32, #tpu.memory_space<vmem>>, vector<2x128xf32>
      tpu.vector_store %arg9[%c0_21, %c0_22], %24 {strides = array<i32>} : memref<2x128xf32, #tpu.memory_space<vmem>>, vector<2x128xf32>,
    } else {
    }
    %c0_15 = arith.constant 0 : index
    %c0_16 = arith.constant 0 : index
    %18 = vector.load %arg9[%c0_15, %c0_16] : memref<2x128xf32, #tpu.memory_space<vmem>>, vector<2x128xf32>
    %19 = arith.addf %18, %14 : vector<2x128xf32>
    %c0_17 = arith.constant 0 : index
    %c0_18 = arith.constant 0 : index
    %20 = vector.load %arg9[%c0_17, %c0_18] : memref<2x128xf32, #tpu.memory_space<vmem>>, vector<2x128xf32>
    tpu.vector_store %arg9[%c0_17, %c0_18], %19 {strides = array<i32>} : memref<2x128xf32, #tpu.memory_space<vmem>>, vector<2x128xf32>,
    %c3_i32 = arith.constant 3 : i32
    %21 = arith.cmpi eq, %arg1, %c3_i32 : i32
    %22 = arith.extui %21 : i1 to i32
    %c0_i32_19 = arith.constant 0 : i32
    %23 = arith.cmpi ne, %22, %c0_i32_19 : i32
    scf.if %23 {
      %c0_20 = arith.constant 0 : index
      %c0_21 = arith.constant 0 : index
      %24 = vector.load %arg9[%c0_20, %c0_21] : memref<2x128xf32, #tpu.memory_space<vmem>>, vector<2x128xf32>
      %c0_22 = arith.constant 0 : index
      %c0_23 = arith.constant 0 : index
      %25 = vector.load %arg8[%c0_22, %c0_23] : memref<2x128xf32, #tpu.memory_space<vmem>>, vector<2x128xf32>
      tpu.vector_store %arg8[%c0_22, %c0_23], %24 {strides = array<i32>} : memref<2x128xf32, #tpu.memory_space<vmem>>, vector<2x128xf32>,
    } else {
    }
    return
  }
  func.func @transform_0(%arg0: i32, %arg1: i32) -> (i32, i32, i32) {
    %c0_i32 = arith.constant 0 : i32
    %c0_i32_0 = arith.constant 0 : i32
    return %arg0, %c0_i32, %arg1 : i32, i32, i32
  }
  func.func @transform_1(%arg0: i32, %arg1: i32) -> (i32, i32) {
    %c0_i32 = arith.constant 0 : i32
    %c0_i32_0 = arith.constant 0 : i32
    return %c0_i32, %arg1 : i32, i32
  }
  func.func @transform_2(%arg0: i32, %arg1: i32) -> (i32, i32) {
    %c0_i32 = arith.constant 0 : i32
    %c0_i32_0 = arith.constant 0 : i32
    return %c0_i32, %arg1 : i32, i32
  }
  func.func @transform_3(%arg0: i32, %arg1: i32) -> (i32, i32) {
    %c0_i32 = arith.constant 0 : i32
    %c0_i32_0 = arith.constant 0 : i32
    return %arg1, %c0_i32 : i32, i32
  }
  func.func @transform_4(%arg0: i32, %arg1: i32) -> (i32, i32) {
    %c0_i32 = arith.constant 0 : i32
    return %arg0, %arg1 : i32, i32
  }
  func.func @transform_5(%arg0: i32, %arg1: i32) -> (i32, i32) {
    %c0_i32 = arith.constant 0 : i32
    return %arg0, %arg1 : i32, i32
  }
  func.func @transform_6(%arg0: i32, %arg1: i32) -> (i32, i32) {
    %c0_i32 = arith.constant 0 : i32
    %c0_i32_0 = arith.constant 0 : i32
    return %arg0, %c0_i32 : i32, i32
  }
}

</mosaic_0001>

<bundles_post_ra>
// kernel: tpu_custom_call.1
= control target key start
LH: loop header
LB: loop body
LE: loop exit
PB: predicated region body
PF: predicated region fallthrough
CT: control target
= control target key end

     0   :  { %s2395_s0 = inlined_call_operand.hbm [shape: f32[2,64,2048], index: 0, kind: input, shape index: {}]   ;;  %s2396_s1 = inlined_call_operand.hbm [shape: f32[1,2048], index: 1, kind: input, shape index: {}]   ;;  %s2397_s2 = inlined_call_operand.hbm [shape: f32[1,2048], index: 2, kind: input, shape index: {}]   ;;  %s2398_s3 = inlined_call_operand.hbm [shape: bf16[2048,128], index: 3, kind: input, shape index: {}]   ;;  %s2399_s4 = inlined_call_operand.hbm [shape: f32[2,2048], index: 4, kind: output, shape index: {0}]   ;;  %s2400_s5 = inlined_call_operand.hbm [shape: f32[2,2048], index: 5, kind: output, shape index: {1}]   ;;  %s2401_s6 = inlined_call_operand.hbm [shape: f32[2,128], index: 6, kind: output, shape index: {2}]  }
   0x1   :  { %2410 = sst [smem:[#allocation27_spill]] %s2396_s1 }
   0x2   :  { %2411 = sst [smem:[#allocation28_spill]] %s2397_s2 }
   0x3   :  { %12 = vsyncpa [#allocation4], 0 }
   0x4   :  { %14 = vsyncpa [#allocation4 + $0x1], 0 }
   0x5   :  { %15 = vsyncpa [#allocation7], 0 }
   0x6   :  { %17 = vsyncpa [#allocation7 + $0x1], 0 }
   0x7   :  { %18 = vsyncpa [#allocation10], 0 }
   0x8   :  { %20 = vsyncpa [#allocation10 + $0x1], 0 }
   0x9   :  { %21 = vsyncpa [#allocation5], 0 }
   0xa   :  { %23 = vsyncpa [#allocation5 + $0x1], 0 }
   0xb   :  { %24 = vsyncpa [#allocation13], 0 }
   0xc   :  { %26 = vsyncpa [#allocation13 + $0x1], 0  ;;  %s1961_s21 = smov 0   ;;  %s1963_s22 = smov 0  }
   0xd   :  { %s1965_s23 = smov 0   ;;  %s1967_s24 = smov 0  }
   0xe   :  { %s1969_s25 = smov 0   ;;  %s1971_s26 = smov 0  }
   0xf LB: > { %2412 = sst [smem:[#allocation21_spill]] %s1890_s21  ;;  %s1992_s27 = sadd.s32 4294967295, %s1910_s26   ;;  %s1910_s26 = sphi %s1971_s26, %s32_s26   ;;  %s1906_s25 = sphi %s1969_s25, %s2441_s25   ;;  %s1902_s24 = sphi %s1967_s24, %s2440_s24   ;;  %s1898_s23 = sphi %s1965_s23, %s2436_s23   ;;  %s1894_s22 = sphi %s1963_s22, %s2439_s22   ;;  %s1890_s21 = sphi %s1961_s21, %s2438_s21  }
  0x10   : > { %2413 = sst [smem:[#allocation22_spill]] %s1898_s23  ;;  %s2402_s28 = sadd.s32 4294967294, %s1910_s26  }
  0x11   : > { %2414 = sst [smem:[#allocation23_spill]] %s1910_s26  ;;  %s41_s29 = sadd.s32 1, %s1906_s25 }
  0x12   : > { %s53_s30 = sadd.s32 1, %s1898_s23  ;;  %p42_p0 = scmp.ge.s32.totalorder %s41_s29, 4 }
  0x13   : > { %p60_p1 = scmp.ne.s32.totalorder %s1898_s23, %s1894_s22  ;;  %p61_p2 = scmp.eq.s32.totalorder %s1910_s26, 0 }
  0x14   : > { %p66_p3 = scmp.ne.s32.totalorder %s1894_s22, %s1890_s21  ;;  %s2443_s29 = smov (%p42_p0, %s41_s29), 0 }
  0x15   : > { %2415 = sst [smem:[#allocation24_spill]] %s2443_s29  ;;  %p2004_p4 = por %p61_p2, %p60_p1 }
  0x16   : > { %p67_p5 = scmp.eq.s32.totalorder %s1992_s27, 0  ;;  %s49_s8 = ssub.s32 %s1906_s25, %s2443_s29 }
  0x17   : > { %p2409_p6 = scmp.eq.s32.totalorder %s1992_s27, 3  ;;  %p51_p7 = scmp.eq.s32.totalorder %s49_s8, 0 }
  0x18   : > { %p2012_p8 = por %p67_p5, %p66_p3  ;;  %p176_p10 = scmp.eq.s32.totalorder %s2402_s28, 3 }
  0x19   : > { %p2018_p9 = por %p2409_p6, %p60_p1  ;;  %p1560_p12 = scmp.lt.s32.totalorder %s1910_s26, 4 }
  0x1a   : > { %s2025_s11 = scalar_select %p51_p7, %s1898_s23, %s53_s30  }
  0x1b   : > { %p2027_p11 = por %p176_p10, %p66_p3  ;;  %s2033_s13 = sand.u32 1, %s1898_s23  }
  0x1c   : > { %2419 = sst [smem:[#allocation25_spill]] %s2025_s11  ;;  %s274_s14 = sand.u32 1, %s1910_s26  }
  0x1d   : > { %s2420_s12 = scalar_select %p2027_p11, 1, 0 }
  0x1e   : > { %s1414_s15 = sshll.u32 %s2033_s13, 2  ;;  %p2039_p13 = pnand %p1560_p12, %p2004_p4 }
  0x1f   : > { %2421 = sst [smem:[#allocation26_spill]] %s2420_s12  ;;  %s1475_s17 = sshll.u32 %s1906_s25, 6 }
  0x20   : > { %s2423_s1 = sld [smem:[#allocation27_spill]]  ;;  %s278_s30 = scalar_lea.vmem [#allocation6], %s1414_s15 }
  0x21   : > { %s286_s8 = sshll.u32 %s278_s30, 4  ;;  %s2424_s2 = sld [smem:[#allocation28_spill]]  ;;  %s287_s8 = int_to_ptr.vmem [resolvable:$true] %s286_s8 }
  0x22   : > { %s2054_s7 = scalar_lea.sflag [#allocation7], %s274_s14  ;;  %p1654_p0 = pneg %p2039_p13 }
  0x23   : > { %s1665_s23 = scalar_lea.vmem %s287_s8, 64  ;;  %s1912_s18 = smov [#allocation6]  }
  0x24   : > { %p1666_p1 = scmp.ne.s32.totalorder %s287_s8, %s1665_s23  ;;  %s1670_s19 = sshll.u32 %s1912_s18, 4  ;;  %s1671_s19 = int_to_ptr.vmem [resolvable:$false] %s1670_s19 }
  0x25   : > { %s1672_s30 = scalar_lea.vmem %s1671_s19, 128  ;;  %p1673_p4 = scmp.lt.s32.totalorder %s287_s8, %s1671_s19 }
  0x26   : > { %s284_s20 = scalar_lea.hbm %s2423_s1, %s1475_s17  ;;  %p1668_p2 = pnand %p1666_p1, %p1654_p0 }
  0x27   : > { %s2052_s11 = scalar_lea.hbm %s2424_s2, %s1475_s17  ;;  %p1674_p5 = scmp.lt.s32.totalorder %s1672_s30, %s1665_s23 }
  0x28   : > { %p1669_p3 = pneg %p1668_p2 }
  0x29   : > { %p1675_p7 = por %p1674_p5, %p1673_p4 }
  0x2b   : > { %p1676_p10 = pnand %p1675_p7, %p1669_p3 }
  0x2d   : > { %1679 = shalt.err (!%p1676_p10)
}
  0x2e   : > { %1546 = dma.hbm_to_vmem [thread:$0]  (!%p2039_p13), %s284_s20, 64, %s287_s8, %s2054_s7  }
  0x2f   : > { %p1423_p12 = scmp.ge.s32.totalorder %s1910_s26, 1  ;;  %p331_p1 = scmp.lt.s32.totalorder %s1910_s26, 5 }
  0x30   : > { %s1411_s23 = sshll.u32 %s2033_s13, 9  ;;  %s1474_s29 = sshll.u32 %s1906_s25, 9 }
  0x31   : > { %p2066_p2 = pnand %p1423_p12, %p331_p1  ;;  %s263_s18 = scalar_lea.hbm %s2395_s0, %s1474_s29 }
  0x32   : > { %s254_s19 = scalar_lea.vmem [#allocation3], %s1411_s23  ;;  %s297_s1 = scalar_lea.vmem [#allocation8], %s1414_s15 }
  0x33   : > { %s264_s30 = sshll.u32 %s254_s19, 4  ;;  %s305_s2 = sshll.u32 %s297_s1, 4  ;;  %s265_s30 = int_to_ptr.vmem [resolvable:$true] %s264_s30  ;;  %s306_s2 = int_to_ptr.vmem [resolvable:$true] %s305_s2 }
  0x34   : > { %s251_s12 = scalar_lea.sflag [#allocation4], %s2033_s13  ;;  %s1693_s20 = scalar_lea.vmem %s265_s30, 8192 }
  0x35   : > { %p1694_p3 = scmp.ne.s32.totalorder %s265_s30, %s1693_s20  ;;  %s1913_s8 = smov [#allocation3]  }
  0x36   : > { %s1698_s21 = sshll.u32 %s1913_s8, 4  ;;  %s1699_s21 = int_to_ptr.vmem [resolvable:$false] %s1698_s21 }
  0x37   : > { %p1696_p4 = pnand %p1694_p3, %p1654_p0  ;;  %s1700_s26 = scalar_lea.vmem %s1699_s21, 16384 }
  0x38   : > { %p1701_p7 = scmp.lt.s32.totalorder %s265_s30, %s1699_s21  ;;  %p1702_p10 = scmp.lt.s32.totalorder %s1700_s26, %s1693_s20 }
  0x39   : > { %p1697_p5 = pneg %p1696_p4 }
  0x3a   : > { %p1703_p12 = por %p1702_p10, %p1701_p7 }
  0x3c   : > { %p1704_p1 = pnand %p1703_p12, %p1697_p5 }
  0x3e   : > { %1707 = shalt.err (!%p1704_p1)
}
  0x3f   : > { %s1914_s23 = smov 2048   ;;  %s1915_s1 = smov 512  }
  0x40   : > { %s1916_s15 = smov 32   ;;  %s1721_s29 = scalar_lea.vmem %s306_s2, 64 }
  0x41   : > { %1543 = dma.hbm_to_vmem [thread:$0]  (!%p2039_p13), %s263_s18, 8192, %s265_s30, %s251_s12, %s1914_s23, %s1915_s1, %s1916_s15  }
  0x42   : > { %p1722_p3 = scmp.ne.s32.totalorder %s306_s2, %s1721_s29  ;;  %s1917_s14 = smov [#allocation8]  }
  0x43   : > { %s1726_s21 = sshll.u32 %s1917_s14, 4  ;;  %s1727_s21 = int_to_ptr.vmem [resolvable:$false] %s1726_s21 }
  0x44   : > { %p1724_p4 = pnand %p1722_p3, %p1654_p0  ;;  %s1728_s26 = scalar_lea.vmem %s1727_s21, 128 }
  0x45   : > { %p1729_p5 = scmp.lt.s32.totalorder %s306_s2, %s1727_s21  ;;  %p1730_p7 = scmp.lt.s32.totalorder %s1728_s26, %s1721_s29 }
  0x46   : > { %p1725_p6 = pneg %p1724_p4 }
  0x47   : > { %p1731_p10 = por %p1730_p7, %p1729_p5 }
  0x49   : > { %p1732_p12 = pnand %p1731_p10, %p1725_p6 }
  0x4b   : > { %1735 = shalt.err (!%p1732_p12)
}
  0x4c   : > { %1549 = dma.hbm_to_vmem [thread:$0]  (!%p2039_p13), %s2052_s11, 64, %s306_s2, %s2054_s7  }
  0x4d   : > { %s1420_s12 = sshll.u32 %s2033_s13, 8  ;;  %s1477_s17 = sshll.u32 %s1906_s25, 12 }
  0x4e   : > { %s322_s30 = scalar_lea.hbm %s2398_s3, %s1477_s17  ;;  %s316_s20 = scalar_lea.vmem [#allocation9], %s1420_s12 }
  0x4f   : > { %s323_s8 = sshll.u32 %s316_s20, 4  ;;  %s313_s23 = scalar_lea.sflag [#allocation10], %s2033_s13  ;;  %s324_s8 = int_to_ptr.vmem [resolvable:$true] %s323_s8 }
  0x50   : > { %s1749_s1 = scalar_lea.vmem %s324_s8, 4096  ;;  %s1918_s15 = smov [#allocation9]  }
  0x51   : > { %p1750_p6 = scmp.ne.s32.totalorder %s324_s8, %s1749_s1  ;;  %s1754_s29 = sshll.u32 %s1918_s15, 4  ;;  %s1755_s29 = int_to_ptr.vmem [resolvable:$false] %s1754_s29 }
  0x52   : > { %s1756_s2 = scalar_lea.vmem %s1755_s29, 8192  ;;  %p1757_p4 = scmp.lt.s32.totalorder %s324_s8, %s1755_s29 }
  0x53   : > { %p1752_p1 = pnand %p1750_p6, %p1654_p0  ;;  %p1758_p5 = scmp.lt.s32.totalorder %s1756_s2, %s1749_s1 }
  0x55   : > { %p1753_p3 = pneg %p1752_p1  ;;  %p1759_p7 = por %p1758_p5, %p1757_p4 }
  0x57   : > { %p1760_p10 = pnand %p1759_p7, %p1753_p3 }
  0x59   : > { %1763 = shalt.err (!%p1760_p10)
}
  0x5a   : > { %s1919_s11 = smov 64   ;;  %s1920_s7 = smov 4  }
  0x5b   : > { %1552 = dma.hbm_to_vmem [thread:$0]  (!%p2039_p13), %s322_s30, 4096, %s324_s8, %s313_s23, %s1919_s11, %s1919_s11, %s1920_s7  }
  0x5c   : > { %335 = sbr.rel (%p2066_p2) target bundleno = 465 (0x1d1), region = 36  ;;  %s2104_s13 = sand.u32 (!%p2066_p2), 1, %s1894_s22  }
  0x5d   : > { %s1424_s14 = sshll.u32 (!%p2066_p2), %s2104_s13, 9  ;;  %s338_s21 = scalar_lea.sflag (!%p2066_p2), [#allocation4], %s2104_s13 }
  0x5e   : > { %s2108_s26 = scalar_lea.vmem (!%p2066_p2), [#allocation3], %s1424_s14 }
  0x61   : > { %1865 = dma.done.wait (%p2012_p8), %s338_s21, 8192  }
  0x62   : > { %1867 = vsyncadd (%p2012_p8), %s338_s21, 4294959104  ;;  %s346_s16 = sand.u32 1, %s1992_s27   ;;  %s1425_s28 = sshll.u32 %s2104_s13, 2 }
  0x63   : > { %s347_s12 = scalar_lea.sflag [#allocation7], %s346_s16  ;;  %s2118_s17 = scalar_lea.vmem [#allocation6], %s1425_s28 }
  0x64   : > { %1869 = dma.done.wait (%p2012_p8), %s347_s12, 128  }
  0x65   : > { %1871 = vsyncadd (%p2012_p8), %s347_s12, 4294967168  ;;  %s1427_s18 = sshll.u32 %s2104_s13, 8  ;;  %s2125_s19 = scalar_lea.vmem [#allocation8], %s1425_s28 }
  0x66   : > { %s365_s30 = scalar_lea.sflag [#allocation10], %s2104_s13  ;;  %s2128_s20 = scalar_lea.vmem [#allocation9], %s1427_s18 }
  0x67   : > { %1873 = dma.done.wait (%p2012_p8), %s365_s30, 4096  }
  0x68   : > { %1875 = vsyncadd (%p2012_p8), %s365_s30, 4294963200  ;;  %v1620_v0 = vld [vmem:[%s2128_s20 + $0x78] sm:$0xff]   ;;  %v1624_v4 = vld [vmem:[%s2128_s20 + $0x70] sm:$0xff]   ;;  %v614_v46 = vlaneseq  ;;  %vm648_vm0 = vcmask 1041409   ;;  %vm650_vm1 = vcmask 1043459   ;;  %s1428_s9 = sshll.u32 %s2104_s13, 3 }
  0x69   : > { %v1621_v1 = vld [vmem:[%s2128_s20 + $0xf8] sm:$0xff]   ;;  %1480 = vmatprep.subr.bf16.mxu0 %v1620_v0  ;;  %v1625_v5 = vld [vmem:[%s2128_s20 + $0xf0] sm:$0xff]   ;;  %v1628_v8 = vld [vmem:[%s2128_s20 + $0x68] sm:$0xff]   ;;  %vm652_vm2 = vcmask 1045509   ;;  %vm654_vm3 = vcmask 1047559   ;;  %s2308_s8 = scalar_lea.vmem [#allocation11], %s1428_s9 }
  0x6a   : > { %v1622_v2 = vld [vmem:[%s2128_s20 + $0x38] sm:$0xff]   ;;  %1502 = vmatprep.subr.bf16.mxu1 %v1621_v1  ;;  %v1626_v6 = vld [vmem:[%s2128_s20 + $0x30] sm:$0xff]   ;;  %v1629_v9 = vld [vmem:[%s2128_s20 + $0xe8] sm:$0xff]   ;;  %v2187_v0 = vshrl.u32 %v614_v46, 7  ;;  %s2315_s23 = scalar_lea.vmem [#allocation12], %s1428_s9  ;;  %p1462_p8 = scmp.ne.s32.totalorder %s1902_s24, 0 }
  0x6b   : > { %v1623_v3 = vld [vmem:[%s2128_s20 + $0xb8] sm:$0xff]   ;;  %1481 = vmatpush3.bf16.msra.mxu0 %v1622_v2  ;;  %v1627_v7 = vld [vmem:[%s2128_s20 + $0xb0] sm:$0xff]   ;;  %v1630_v10 = vld [vmem:[%s2128_s20 + $0x28] sm:$0xff]  }
  0x6c   : > { %1503 = vmatpush3.bf16.msra.mxu1 %v1623_v3  ;;  %1482 = vmatprep.subr.bf16.mxu0 %v1624_v4  ;;  %v1631_v11 = vld [vmem:[%s2128_s20 + $0xa8] sm:$0xff]   ;;  %v1632_v12 = vld [vmem:[%s2128_s20 + $0x60] sm:$0xff]   ;;  %v1636_v16 = vld [vmem:[%s2128_s20 + $0x58] sm:$0xff]  }
  0x6d   : > { %1504 = vmatprep.subr.bf16.mxu1 %v1625_v5  ;;  %v1633_v13 = vld [vmem:[%s2128_s20 + $0xe0] sm:$0xff]   ;;  %v1637_v17 = vld [vmem:[%s2128_s20 + $0xd8] sm:$0xff]   ;;  %v1640_v20 = vld [vmem:[%s2128_s20 + $0x50] sm:$0xff]  }
  0x6e   : > { %v1634_v14 = vld [vmem:[%s2128_s20 + $0x20] sm:$0xff]   ;;  %v1638_v18 = vld [vmem:[%s2128_s20 + $0x18] sm:$0xff]   ;;  %v1641_v21 = vld [vmem:[%s2128_s20 + $0xd0] sm:$0xff]  }
  0x6f   : > { %1483 = vmatpush3.bf16.msra.mxu0 %v1626_v6  ;;  %v1635_v15 = vld [vmem:[%s2128_s20 + $0xa0] sm:$0xff]   ;;  %v1639_v19 = vld [vmem:[%s2128_s20 + $0x98] sm:$0xff]   ;;  %v1642_v22 = vld [vmem:[%s2128_s20 + $0x10] sm:$0xff]  }
  0x70   : > { %1505 = vmatpush3.bf16.msra.mxu1 %v1627_v7  ;;  %1484 = vmatprep.subr.bf16.mxu0 %v1628_v8  ;;  %v1643_v23 = vld [vmem:[%s2128_s20 + $0x90] sm:$0xff]   ;;  %v1644_v24 = vld [vmem:[%s2128_s20 + $0x48] sm:$0xff]   ;;  %v1648_v28 = vld [vmem:[%s2128_s20 + $0x40] sm:$0xff]  }
  0x71   : > { %1506 = vmatprep.subr.bf16.mxu1 %v1629_v9  ;;  %v1645_v25 = vld [vmem:[%s2128_s20 + $0xc8] sm:$0xff]   ;;  %v1649_v29 = vld [vmem:[%s2128_s20 + $0xc0] sm:$0xff]   ;;  %v425_v32 = vld [vmem:[%s2108_s26] sm:$0xff] }
  0x72   : > { %v1646_v26 = vld [vmem:[%s2128_s20 + $0x8] sm:$0xff]   ;;  %v1650_v30 = vld [vmem:[%s2128_s20] sm:$0xff]   ;;  %v426_v33 = vld [vmem:[%s2108_s26 + $0x8] sm:$0xff] }
  0x73   : > { %1485 = vmatpush3.bf16.msra.mxu0 %v1630_v10  ;;  %v1647_v27 = vld [vmem:[%s2128_s20 + $0x88] sm:$0xff]   ;;  %v1651_v31 = vld [vmem:[%s2128_s20 + $0x80] sm:$0xff]   ;;  %v429_v34 = vld [vmem:[%s2108_s26 + $0x20] sm:$0xff] }
  0x74   : > { %1507 = vmatpush3.bf16.msra.mxu1 %v1631_v11  ;;  %1486 = vmatprep.subr.bf16.mxu0 %v1632_v12  ;;  %v430_v35 = vld [vmem:[%s2108_s26 + $0x28] sm:$0xff]  ;;  %v433_v36 = vld [vmem:[%s2108_s26 + $0x40] sm:$0xff]  ;;  %v489_v38 = vadd.f32 %v429_v34, %v425_v32 }
  0x75   : > { %1508 = vmatprep.subr.bf16.mxu1 %v1633_v13  ;;  %v434_v37 = vld [vmem:[%s2108_s26 + $0x48] sm:$0xff]  ;;  %v437_v39 = vld [vmem:[%s2108_s26 + $0x60] sm:$0xff]  ;;  %v502_v40 = vadd.f32 %v430_v35, %v426_v33 }
  0x76   : > { %v438_v41 = vld [vmem:[%s2108_s26 + $0x68] sm:$0xff]  ;;  %v490_v42 = vadd.f32 %v489_v38, %v433_v36  ;;  %v441_v43 = vld [vmem:[%s2108_s26 + $0x80] sm:$0xff]  ;;  %v440_v38 = vld [vmem:[%s2108_s26 + $0x78] sm:$0xff] }
  0x77   : > { %1487 = vmatpush3.bf16.msra.mxu0 %v1634_v14  ;;  %v442_v44 = vld [vmem:[%s2108_s26 + $0x88] sm:$0xff]  ;;  %v503_v45 = vadd.f32 %v502_v40, %v434_v37  ;;  %v445_v47 = vld [vmem:[%s2108_s26 + $0xa0] sm:$0xff] }
  0x78   : > { %1509 = vmatpush3.bf16.msra.mxu1 %v1635_v15  ;;  %1488 = vmatprep.subr.bf16.mxu0 %v1636_v16  ;;  %v457_v48 = vld [vmem:[%s2108_s26 + $0x100] sm:$0xff]  ;;  %v458_v49 = vld [vmem:[%s2108_s26 + $0x108] sm:$0xff]  ;;  %v491_v50 = vadd.f32 %v490_v42, %v437_v39  ;;  %v427_v15 = vld [vmem:[%s2108_s26 + $0x10] sm:$0xff]  ;;  %v666_v42 = vsub.s32 1, %v2187_v0 }
  0x79   : > { %1510 = vmatprep.subr.bf16.mxu1 %v1637_v17  ;;  %v461_v51 = vld [vmem:[%s2108_s26 + $0x120] sm:$0xff]  ;;  %v462_v52 = vld [vmem:[%s2108_s26 + $0x128] sm:$0xff]  ;;  %v504_v54 = vadd.f32 %v503_v45, %v438_v41  ;;  %v428_v16 = vld [vmem:[%s2108_s26 + $0x18] sm:$0xff] }
  0x7a   : > { %v465_v53 = vld [vmem:[%s2108_s26 + $0x140] sm:$0xff]  ;;  %v446_v55 = vld [vmem:[%s2108_s26 + $0xa8] sm:$0xff]  ;;  %v492_v57 = vadd.f32 %v491_v50, %v441_v43  ;;  %v541_v58 = vadd.f32 %v461_v51, %v457_v48  ;;  %v554_v59 = vadd.f32 %v462_v52, %v458_v49  ;;  %v443_v43 = vld [vmem:[%s2108_s26 + $0x90] sm:$0xff] }
  0x7b   : > { %1489 = vmatpush3.bf16.msra.mxu0 %v1638_v18  ;;  %v466_v56 = vld [vmem:[%s2108_s26 + $0x148] sm:$0xff]  ;;  %v449_v60 = vld [vmem:[%s2108_s26 + $0xc0] sm:$0xff]  ;;  %v505_v63 = vadd.f32 %v504_v54, %v442_v44  ;;  %v662_v18 = vsub.s32 0, %v2187_v0  ;;  %v444_v44 = vld [vmem:[%s2108_s26 + $0x98] sm:$0xff] }
  0x7c   : > { %1511 = vmatpush3.bf16.msra.mxu1 %v1639_v19  ;;  %1490 = vmatprep.subr.bf16.mxu0 %v1640_v20  ;;  %v469_v61 = vld [vmem:[%s2108_s26 + $0x160] sm:$0xff]  ;;  %v470_v62 = vld [vmem:[%s2108_s26 + $0x168] sm:$0xff]  ;;  %v493_v4 = vadd.f32 %v492_v57, %v445_v47  ;;  %v542_v5 = vadd.f32 %v541_v58, %v465_v53  ;;  %v555_v6 = vadd.f32 %v554_v59, %v466_v56  ;;  %v431_v19 = vld [vmem:[%s2108_s26 + $0x30] sm:$0xff] }
  0x7d   : > { %1512 = vmatprep.subr.bf16.mxu1 %v1641_v21  ;;  %v450_v1 = vld [vmem:[%s2108_s26 + $0xc8] sm:$0xff]  ;;  %v453_v2 = vld [vmem:[%s2108_s26 + $0xe0] sm:$0xff]  ;;  %v506_v10 = vadd.f32 %v505_v63, %v446_v55  ;;  %v432_v20 = vld [vmem:[%s2108_s26 + $0x38] sm:$0xff] }
  0x7e   : > { %v454_v3 = vld [vmem:[%s2108_s26 + $0xe8] sm:$0xff]  ;;  %v473_v7 = vld [vmem:[%s2108_s26 + $0x180] sm:$0xff]  ;;  %v494_v12 = vadd.f32 %v493_v4, %v449_v60  ;;  %v543_v13 = vadd.f32 %v542_v5, %v469_v61  ;;  %v556_v14 = vadd.f32 %v555_v6, %v470_v62  ;;  %v435_v21 = vld [vmem:[%s2108_s26 + $0x50] sm:$0xff]  ;;  %v528_v32 = vadd.f32 %v432_v20, %v428_v16 }
  0x7f   : > { %1491 = vmatpush3.bf16.msra.mxu0 %v1642_v22  ;;  %v474_v8 = vld [vmem:[%s2108_s26 + $0x188] sm:$0xff]  ;;  %v477_v9 = vld [vmem:[%s2108_s26 + $0x1a0] sm:$0xff]  ;;  %v507_v17 = vadd.f32 %v506_v10, %v450_v1  ;;  %v459_v45 = vld [vmem:[%s2108_s26 + $0x110] sm:$0xff] }
  0x80   : > { %1513 = vmatpush3.bf16.msra.mxu1 %v1643_v23  ;;  %1492 = vmatprep.subr.bf16.mxu0 %v1644_v24  ;;  %v478_v11 = vld [vmem:[%s2108_s26 + $0x1a8] sm:$0xff]  ;;  %v495_v22 = vadd.f32 %v494_v12, %v453_v2  ;;  %v544_v23 = vadd.f32 %v543_v13, %v473_v7  ;;  %v557_v24 = vadd.f32 %v556_v14, %v474_v8  ;;  %v485_v33 = vld [vmem:[%s2108_s26 + $0x1e0] sm:$0xff]  ;;  %v460_v50 = vld [vmem:[%s2108_s26 + $0x118] sm:$0xff] }
  0x81   : > { %1514 = vmatprep.subr.bf16.mxu1 %v1645_v25  ;;  %v2203_v25 = vld [vmem:[%s2118_s17] sm:$0xf]  ;;  %v486_v34 = vld [vmem:[%s2108_s26 + $0x1e8] sm:$0xff]  ;;  %v463_v51 = vld [vmem:[%s2108_s26 + $0x130] sm:$0xff] }
  0x82   : > { %v496_v35 = vrot.slane %v495_v22, 4  ;;  %v545_v36 = vadd.f32 %v544_v23, %v477_v9  ;;  %v558_v37 = vadd.f32 %v557_v24, %v478_v11  ;;  %v2215_v41 = vrot.slane %v2203_v25, %v662_v18  ;;  %v464_v52 = vld [vmem:[%s2108_s26 + $0x138] sm:$0xff]  ;;  %v447_v55 = vld [vmem:[%s2108_s26 + $0xb0] sm:$0xff] }
  0x83   : > { %1493 = vmatpush3.bf16.msra.mxu0 %v1646_v26  ;;  %v436_v26 = vld [vmem:[%s2108_s26 + $0x58] sm:$0xff]  ;;  %v467_v56 = vld [vmem:[%s2108_s26 + $0x150] sm:$0xff]  ;;  %v567_v59 = vadd.f32 %v463_v51, %v459_v45  ;;  %v580_v60 = vadd.f32 %v464_v52, %v460_v50 }
  0x84   : > { %1515 = vmatpush3.bf16.msra.mxu1 %v1647_v27  ;;  %1494 = vmatprep.subr.bf16.mxu0 %v1648_v28  ;;  %v515_v27 = vadd.f32 %v431_v19, %v427_v15  ;;  %v481_v28 = vld [vmem:[%s2108_s26 + $0x1c0] sm:$0xff]  ;;  %v529_v46 = vadd.f32 %v528_v32, %v436_v26  ;;  %v497_v47 = vadd.f32 %v496_v35, %v495_v22  ;;  %v468_v57 = vld [vmem:[%s2108_s26 + $0x158] sm:$0xff]  ;;  %v471_v2 = vld [vmem:[%s2108_s26 + $0x170] sm:$0xff] }
  0x85   : > { %1516 = vmatprep.subr.bf16.mxu1 %v1649_v29  ;;  %v482_v29 = vld [vmem:[%s2108_s26 + $0x1c8] sm:$0xff]  ;;  %v546_v48 = vadd.f32 %v545_v36, %v481_v28  ;;  %v448_v1 = vld [vmem:[%s2108_s26 + $0xb8] sm:$0xff]  ;;  %v451_v6 = vld [vmem:[%s2108_s26 + $0xd0] sm:$0xff]  ;;  %v568_v8 = vadd.f32 %v567_v59, %v467_v56  ;;  %v581_v9 = vadd.f32 %v580_v60, %v468_v57 }
  0x86   : > { %v516_v39 = vadd.f32 %v515_v27, %v435_v21  ;;  %v559_v49 = vadd.f32 %v558_v37, %v482_v29  ;;  %v530_v58 = vadd.f32 %v529_v46, %v440_v38  ;;  %v498_v61 = vrot.slane %v497_v47, 2  ;;  %v452_v13 = vld [vmem:[%s2108_s26 + $0xd8] sm:$0xff]  ;;  %v475_v14 = vld [vmem:[%s2108_s26 + $0x190] sm:$0xff] }
  0x87   : > { %1495 = vmatpush3.bf16.msra.mxu0 %v1650_v30  ;;  %v508_v30 = vadd.f32 %v507_v17, %v454_v3  ;;  %v547_v62 = vadd.f32 %v546_v48, %v485_v33  ;;  %v472_v3 = vld [vmem:[%s2108_s26 + $0x178] sm:$0xff]  ;;  %v455_v19 = vld [vmem:[%s2108_s26 + $0xf0] sm:$0xff]  ;;  %v569_v21 = vadd.f32 %v568_v8, %v471_v2 }
  0x88   : > { %1517 = vmatpush3.bf16.msra.mxu1 %v1651_v31  ;;  %v439_v31 = vld [vmem:[%s2108_s26 + $0x70] sm:$0xff]  ;;  %v560_v63 = vadd.f32 %v559_v49, %v486_v34  ;;  %v531_v7 = vadd.f32 %v530_v58, %v444_v44  ;;  %v499_v10 = vadd.f32 %v498_v61, %v497_v47  ;;  %v476_v15 = vld [vmem:[%s2108_s26 + $0x198] sm:$0xff]  ;;  %v582_v22 = vadd.f32 %v581_v9, %v472_v3 }
  0x89   : > { %v509_v40 = vrot.slane %v508_v30, 4  ;;  %v517_v53 = vadd.f32 %v516_v39, %v439_v31  ;;  %v548_v11 = vrot.slane %v547_v62, 4  ;;  %v456_v27 = vld [vmem:[%s2108_s26 + $0xf8] sm:$0xff]  ;;  %v479_v28 = vld [vmem:[%s2108_s26 + $0x1b0] sm:$0xff]  ;;  %v570_v33 = vadd.f32 %v569_v21, %v475_v14 }
  0x8a   : > { %v561_v12 = vrot.slane %v560_v63, 4  ;;  %v532_v20 = vadd.f32 %v531_v7, %v448_v1  ;;  %v500_v23 = vrot.slane %v499_v10, 1  ;;  %v480_v29 = vld [vmem:[%s2108_s26 + $0x1b8] sm:$0xff]  ;;  %v583_v34 = vadd.f32 %v582_v22, %v476_v15  ;;  %v483_v38 = vld [vmem:[%s2108_s26 + $0x1d0] sm:$0xff] }
  0x8b   : > { %v510_v54 = vadd.f32 %v509_v40, %v508_v30  ;;  %v518_v4 = vadd.f32 %v517_v53, %v443_v43  ;;  %v549_v24 = vadd.f32 %v548_v11, %v547_v62  ;;  %v484_v43 = vld [vmem:[%s2108_s26 + $0x1d8] sm:$0xff]  ;;  %v571_v45 = vadd.f32 %v570_v33, %v479_v28  ;;  %v487_v50 = vld [vmem:[%s2108_s26 + $0x1f0] sm:$0xff] }
  0x8c   : > { %v562_v26 = vadd.f32 %v561_v12, %v560_v63  ;;  %v533_v32 = vadd.f32 %v532_v20, %v452_v13  ;;  %v501_v35 = vadd.f32 %v500_v23, %v499_v10  ;;  %v584_v46 = vadd.f32 %v583_v34, %v480_v29 }
  0x8d   : > { %v511_v5 = vrot.slane %v510_v54, 2  ;;  %v519_v16 = vadd.f32 %v518_v4, %v447_v55  ;;  %v550_v36 = vrot.slane %v549_v24, 2  ;;  %v667_v53 = vrot.slane %v2203_v25, %v666_v42 }
  0x8e   : > { %v563_v37 = vrot.slane %v562_v26, 2  ;;  %v534_v44 = vadd.f32 %v533_v32, %v456_v27  ;;  %v2240_v49 = vmul.f32 0.015625, %v501_v35  ;;  %v572_v56 = vadd.f32 %v571_v45, %v483_v38 }
  0x8f   : > { %v512_v17 = vadd.f32 %v511_v5, %v510_v54  ;;  %v520_v30 = vadd.f32 %v519_v16, %v451_v6  ;;  %v551_v47 = vadd.f32 %v550_v36, %v549_v24  ;;  %v2249_v54 = vld [vmem:[%s2125_s19] sm:$0xf]  ;;  %v585_v60 = vadd.f32 %v584_v46, %v484_v43  ;;  %v488_v5 = vld [vmem:[%s2108_s26 + $0x1f8] sm:$0xff] }
  0x90   : > { %v564_v48 = vadd.f32 %v563_v37, %v562_v26  ;;  %v535_v55 = vrot.slane %v534_v44, 4  ;;  %v680_v61 = vmul.f32 %v2215_v41, %v2240_v49  ;;  %v573_v1 = vadd.f32 %v572_v56, %v487_v50 }
  0x91   : > { %v513_v31 = vrot.slane %v512_v17, 1  ;;  %v521_v39 = vadd.f32 %v520_v30, %v455_v19  ;;  %v552_v57 = vrot.slane %v551_v47, 1  ;;  %v697_v4 = vrot.slane %v2249_v54, %v666_v42 }
  0x92   : > { %v565_v58 = vrot.slane %v564_v48, 1  ;;  %v536_v63 = vadd.f32 %v535_v55, %v534_v44  ;;  %v693_v7 = vrot.slane %v2249_v54, %v662_v18  ;;  %v574_v9 = vrot.slane %v573_v1, 4 }
  0x93   : > { %v514_v40 = vadd.f32 %v513_v31, %v512_v17  ;;  %v522_v51 = vrot.slane %v521_v39, 4  ;;  %v553_v2 = vadd.f32 %v552_v57, %v551_v47  ;;  %v586_v42 = vadd.f32 %v585_v60, %v488_v5 }
  0x94   : > { %v566_v3 = vadd.f32 %v565_v58, %v564_v48  ;;  %v537_v8 = vrot.slane %v536_v63, 2  ;;  %v2267_v14 = vadd.f32 %v693_v7, %v680_v61  ;;  %v575_v16 = vadd.f32 %v574_v9, %v573_v1 }
  0x95   : > { %v2243_v52 = vmul.f32 0.015625, %v514_v40  ;;  %v523_v59 = vadd.f32 %v522_v51, %v521_v39  ;;  %v2261_v10 = vmul.f32 0.015625, %v553_v2  ;;  %v1921_v17 = vmov 1983009808  }
  0x96   : > { %v2263_v11 = vmul.f32 0.015625, %v566_v3  ;;  %v538_v15 = vadd.f32 %v537_v8, %v536_v63  ;;  %v612_v19 = vunpack.c.l.s4 %v1921_v17  ;;  %v576_v23 = vrot.slane %v575_v16, 2 }
  0x97   : > { %v681_v62 = vmul.f32 %v667_v53, %v2243_v52  ;;  %v524_v6 = vrot.slane %v523_v59, 2  ;;  %v684_v20 = vmul.f32 %v2215_v41, %v2261_v10  ;;  %v670_v24 = vsub.s32 2, %v2187_v0 }
  0x98   : > { %v685_v18 = vmul.f32 %v667_v53, %v2263_v11  ;;  %v539_v22 = vrot.slane %v538_v15, 1  ;;  %v577_v31 = vadd.f32 %v576_v23, %v575_v16  ;;  %v587_v32 = vrot.slane %v586_v42, 4 }
  0x99   : > { %v2265_v12 = vadd.f32 %v697_v4, %v681_v62  ;;  %v525_v13 = vadd.f32 %v524_v6, %v523_v59  ;;  %v2273_v26 = vadd.f32 %v693_v7, %v684_v20  ;;  %v769_v41 = vpack.c.bf16 %v2267_v14, %v2267_v14 }
  0x9a   : > { %v2275_v27 = vadd.f32 %v697_v4, %v685_v18  ;;  %v540_v30 = vadd.f32 %v539_v22, %v538_v15  ;;  %v613_v33 = vunpack.c.0.s8 %v612_v19  ;;  %v578_v37 = vrot.slane %v577_v31, 1 }
  0x9b   : > { %v526_v21 = vrot.slane %v525_v13, 1  ;;  %v770_v28 = vpack.c.bf16 %v2265_v12, %v2265_v12  ;;  %v773_v36 = vpack.c.bf16 %v2273_v26, %v2273_v26  ;;  %v588_v38 = vadd.f32 %v587_v32, %v586_v42 }
  0x9c   : > { %v774_v34 = vpack.c.bf16 %v2275_v27, %v2275_v27  ;;  %v671_v39 = vrot.slane %v2203_v25, %v670_v24  ;;  %v674_v40 = vsub.s32 3, %v2187_v0  ;;  %v849_v45 = vunpack.c.l.b16 %v769_v41 }
  0x9d   : > { %v527_v29 = vadd.f32 %v526_v21, %v525_v13  ;;  %v850_v43 = vunpack.c.l.b16 %v770_v28  ;;  %v853_v46 = vunpack.c.l.b16 %v773_v36  ;;  %v579_v47 = vadd.f32 %v578_v37, %v577_v31 }
  0x9e   : > { %v854_v44 = vunpack.c.l.b16 %v774_v34  ;;  %v589_v48 = vrot.slane %v588_v38, 2  ;;  %v596_v50 = vmul.f32 0.015625, %v540_v30  ;;  %v675_v58 = vrot.slane %v2203_v25, %v674_v40 }
  0x9f   : > { %v595_v35 = vmul.f32 0.015625, %v527_v29  ;;  %v857_v55 = vrot.slane %v853_v46, 7  ;;  %v599_v57 = vmul.f32 0.015625, %v579_v47  ;;  %v701_v59 = vrot.slane %v2249_v54, %v670_v24 }
  0xa0   : > { %v859_v51 = vrot.slane %v854_v44, 7  ;;  %v590_v56 = vadd.f32 %v589_v48, %v588_v38  ;;  %v609_v60 = vcombine.low %v2240_v49, %v2243_v52  ;;  %v616_v61 = vsub.s32 %v613_v33, %v2187_v0 }
  0xa1   : > { %v682_v53 = vmul.f32 %v671_v39, %v595_v35  ;;  %v858_v63 = vsel %vm648_vm0, %v857_v55, %v849_v45  ;;  %v683_v3 = vmul.f32 %v675_v58, %v596_v50  ;;  %v686_v4 = vmul.f32 %v671_v39, %v599_v57 }
  0xa2   : > { %v860_v62 = vsel %vm648_vm0, %v859_v51, %v850_v43  ;;  %v591_v2 = vrot.slane %v590_v56, 1  ;;  %v626_v5 = vcombine.low %v2261_v10, %v2263_v11  ;;  %v610_v6 = vcombine.low %v595_v35, %v596_v50 }
  0xa3   : > { %v866_v1 = vpack.c.b16 %v860_v62, %v860_v62  ;;  %v712_v25 = vadd.f32 %v701_v59, %v682_v53  ;;  %v865_v7 = vpack.c.b16 %v858_v63, %v858_v63  ;;  %v705_v49 = vrot.slane %v2249_v54, %v674_v40 }
  0xa4   : > { %v592_v8 = vadd.f32 %v591_v2, %v590_v56  ;;  %v716_v52 = vadd.f32 %v701_v59, %v686_v4  ;;  %v617_v0 = vrot.slane %v609_v60, %v616_v61  ;;  %v726_v9 = vcombine.low %v2267_v14, %v2265_v12 }
  0xa5   : > { %1097 = vmatprep.mubr.bf16.mxu0 %v866_v1  ;;  %v713_v15 = vadd.f32 %v705_v49, %v683_v3  ;;  %v634_v42 = vrot.slane %v626_v5, %v616_v61  ;;  %v743_v10 = vcombine.low %v2273_v26, %v2275_v27  ;;  %v624_v11 = vrot.slane %v610_v6, %v616_v61 }
  0xa6   : > { %1098 = vmatmul.mubr.bf16.vlgmr.msra.gmra.mxu0 %v865_v7  ;;  %v600_v13 = vmul.f32 0.015625, %v592_v8  ;;  %v775_v16 = vpack.c.bf16 %v716_v52, %v716_v52  ;;  %v771_v17 = vpack.c.bf16 %v712_v25, %v712_v25  ;;  %v734_v21 = vrot.slane %v726_v9, %v616_v61 }
  0xa7   : > { %v727_v18 = vcombine.low %v712_v25, %v713_v15  ;;  %v772_v24 = vpack.c.bf16 %v713_v15, %v713_v15  ;;  %v751_v28 = vrot.slane %v743_v10, %v616_v61  ;;  %v625_v12 = vcombine.low %v617_v0, %v624_v11 }
  0xa8   : > { %v627_v19 = vcombine.low %v599_v57, %v600_v13  ;;  %v687_v20 = vmul.f32 %v675_v58, %v600_v13  ;;  %v855_v54 = vunpack.c.l.b16 %v775_v16  ;;  %v851_v14 = vunpack.c.l.b16 %v771_v17 }
  0xa9   : > { %v741_v31 = vrot.slane %v727_v18, %v616_v61  ;;  %v852_v33 = vunpack.c.l.b16 %v772_v24 }
  0xaa   : > { %v641_v22 = vrot.slane %v627_v19, %v616_v61  ;;  %v717_v23 = vadd.f32 %v705_v49, %v687_v20  ;;  %v861_v29 = vrot.slane %v855_v54, 7 }
  0xab   : > { %v742_v37 = vcombine.low %v734_v21, %v741_v31 }
  0xac   : > { %v642_v30 = vcombine.low %v634_v42, %v641_v22  ;;  %v744_v32 = vcombine.low %v716_v52, %v717_v23  ;;  %v776_v41 = vpack.c.bf16 %v717_v23, %v717_v23  ;;  %v862_v35 = vsel %vm648_vm0, %v861_v29, %v851_v14 }
  0xad   : > { %v867_v46 = vpack.c.b16 %v862_v35, %v862_v35 }
  0xae   : > { %v647_v26 = vrot.slane %v642_v30, 7  ;;  %v758_v27 = vrot.slane %v744_v32, %v616_v61  ;;  %v856_v34 = vunpack.c.l.b16 %v776_v41 }
  0xb0   : > { %v649_v36 = vsel %vm648_vm0, %v647_v26, %v625_v12  ;;  %v759_v38 = vcombine.low %v751_v28, %v758_v27  ;;  %v863_v39 = vrot.slane %v856_v34, 7 }
  0xb1   : > { %v651_v40 = vsel %vm650_vm1, %v647_v26, %v649_v36 }
  0xb2   : > { %v653_v43 = vsel %vm652_vm2, %v647_v26, %v651_v40  ;;  %v762_v44 = vrot.slane %v759_v38, 7  ;;  %v864_v45 = vsel %vm648_vm0, %v863_v39, %v852_v33 }
  0xb3   : > { %v655_v47 = vsel %vm654_vm3, %v647_v26, %v653_v43  ;;  %v868_v48 = vpack.c.b16 %v864_v45, %v864_v45 }
  0xb4   : > { %657 = vst [vmem:[%s2308_s8] sm:$0xff] %v655_v47  ;;  %v763_v50 = vsel %vm648_vm0, %v762_v44, %v742_v37 }
  0xb5   : > { %v764_v51 = vsel %vm650_vm1, %v762_v44, %v763_v50  ;;  %1137 = vmatprep.mubr.bf16.mxu1 %v868_v48 }
  0xb6   : > { %v765_v53 = vsel %vm652_vm2, %v762_v44, %v764_v51  ;;  %1138 = vmatmul.mubr.bf16.vlgmr.msra.gmra.mxu1 %v867_v46 }
  0xb7   : > { %v766_v55 = vsel %vm654_vm3, %v762_v44, %v765_v53 }
  0xb8   : > { %768 = vst [vmem:[%s2315_s23] sm:$0xff] %v766_v55 }
 0x166   : > { %v1496_v56 = vpop.f32.mrf.mxu0 }
 0x168   : > { %v1497_v57 = vpop.f32.mrf.mxu0 }
 0x169   : > { %v1498_v61 = vadd.f32 %v1497_v57, %v1496_v56 }
 0x16a   : > { %v1499_v58 = vpop.f32.mrf.mxu0 }
 0x16c   : > { %v1500_v59 = vpop.f32.mrf.mxu0 }
 0x176   : > { %v1518_v60 = vpop.f32.mrf.mxu1 }
 0x178   : > { %v1519_v62 = vpop.f32.mrf.mxu1  ;;  %1148 = sbr.rel (%p1462_p8) target bundleno = 383 (0x17f), region = 56 }
 0x179   : > { %v1520_v63 = vadd.f32 %v1519_v62, %v1518_v60 }
 0x17a   : > { %v1521_v1 = vpop.f32.mrf.mxu1 }
 0x17b   : > { %v1140_v2 = vadd.f32 %v1520_v63, %v1498_v61 }
 0x17c   : > { %v1522_v3 = vpop.f32.mrf.mxu1 }
 0x17d   : > { %v1922_v4 = vmov 0.0  }
 0x17e   : > { %1149 = vst [vmem:[#allocation2] sm:$0x3] %v1922_v4 }
 0x17f PF: > { %p1463_p13 = scmp.ne.s32.totalorder %s1902_s24, 3 }
 0x184   : > { %1156 = sbr.rel (%p1463_p13) target bundleno = 401 (0x191), region = 60 }
 0x185   : > { %v1150_v5 = vld [vmem:[#allocation2] sm:$0x3] }
 0x186   : > { %v1151_v6 = vadd.f32 %v1150_v5, %v1140_v2 }
 0x188   : > { %1152 = vst [vmem:[#allocation2] sm:$0x3] %v1151_v6 }
 0x18f   : > { %v1157_v25 = vld [vmem:[#allocation2] sm:$0x3] }
 0x190   : > { %1158 = vst [vmem:[#allocation14] sm:$0x3] %v1157_v25 }
 0x191 PF: > { %s1478_s1 = sshll.u32 %s1902_s24, 7  ;;  %s1197_s11 = sshll.u32 %s2315_s23, 4  ;;  %s1198_s11 = int_to_ptr.vmem [resolvable:$true] %s1197_s11 }
 0x192   : > { %s1195_s2 = scalar_lea.hbm %s2400_s5, %s1478_s1  ;;  %s1165_s7 = scalar_lea.sflag [#allocation13], %s346_s16 }
 0x193   : > { %s1764_s14 = scalar_lea.vmem %s1198_s11, 128  ;;  %s1923_s21 = smov [#allocation12]  }
 0x194   : > { %p1765_p0 = scmp.ne.s32.totalorder %s1198_s11, %s1764_s14  ;;  %s1768_s26 = sshll.u32 %s1923_s21, 4  ;;  %s1769_s26 = int_to_ptr.vmem [resolvable:$false] %s1768_s26 }
 0x195   : > { %s1770_s28 = scalar_lea.vmem %s1769_s26, 256  ;;  %p1771_p6 = scmp.lt.s32.totalorder %s1198_s11, %s1769_s26 }
 0x196   : > { %p1766_p2 = pnand %p1765_p0, %p2018_p9  ;;  %p1772_p1 = scmp.lt.s32.totalorder %s1770_s28, %s1764_s14 }
 0x198   : > { %p1767_p12 = pneg %p1766_p2  ;;  %p1773_p3 = por %p1772_p1, %p1771_p6 }
 0x19a   : > { %p1774_p4 = pnand %p1773_p3, %p1767_p12 }
 0x19c   : > { %1777 = shalt.err (!%p1774_p4)
}
 0x19d   : > { %s1778_s12 = scalar_lea.hbm %s1195_s2, 128  ;;  %s1782_s18 = scalar_lea.hbm %s2400_s5, 512 }
 0x19e   : > { %p1779_p5 = scmp.ne.s32.totalorder %s1195_s2, %s1778_s12  ;;  %p1783_p8 = scmp.lt.s32.totalorder %s1195_s2, %s2400_s5 }
 0x19f   : > { %p1784_p13 = scmp.lt.s32.totalorder %s1782_s18, %s1778_s12 }
 0x1a0   : > { %p1780_p7 = pnand %p1779_p5, %p2018_p9 }
 0x1a1   : > { %p1785_p0 = por %p1784_p13, %p1783_p8 }
 0x1a2   : > { %p1781_p10 = pneg %p1780_p7 }
 0x1a4   : > { %p1786_p2 = pnand %p1785_p0, %p1781_p10 }
 0x1a6   : > { %1789 = shalt.err (!%p1786_p2)
}
 0x1a7   : > { %1533 = dma.vmem_to_hbm [thread:$0]  (%p2018_p9), %s1198_s11, 128, %s1195_s2, %s1165_s7  }
 0x1a8   : > { %s1179_s23 = scalar_lea.hbm %s2399_s4, %s1478_s1  ;;  %s1181_s15 = sshll.u32 %s2308_s8, 4  ;;  %s1182_s15 = int_to_ptr.vmem [resolvable:$true] %s1181_s15 }
 0x1a9   : > { %s1160_s29 = scalar_lea.sflag [#allocation5], %s2104_s13  ;;  %s1790_s14 = scalar_lea.vmem %s1182_s15, 128 }
 0x1aa   : > { %p1791_p12 = scmp.ne.s32.totalorder %s1182_s15, %s1790_s14  ;;  %s1924_s21 = smov [#allocation11]  }
 0x1ab   : > { %s1794_s26 = sshll.u32 %s1924_s21, 4  ;;  %s1795_s26 = int_to_ptr.vmem [resolvable:$false] %s1794_s26 }
 0x1ac   : > { %p1792_p6 = pnand %p1791_p12, %p2018_p9  ;;  %s1796_s28 = scalar_lea.vmem %s1795_s26, 256 }
 0x1ad   : > { %p1797_p3 = scmp.lt.s32.totalorder %s1182_s15, %s1795_s26  ;;  %p1798_p4 = scmp.lt.s32.totalorder %s1796_s28, %s1790_s14 }
 0x1ae   : > { %p1793_p1 = pneg %p1792_p6 }
 0x1af   : > { %p1799_p5 = por %p1798_p4, %p1797_p3 }
 0x1b1   : > { %p1800_p7 = pnand %p1799_p5, %p1793_p1 }
 0x1b3   : > { %1803 = shalt.err (!%p1800_p7)
}
 0x1b4   : > { %s1804_s24 = scalar_lea.hbm %s1179_s23, 128  ;;  %s1808_s1 = scalar_lea.hbm %s2399_s4, 512 }
 0x1b5   : > { %p1805_p10 = scmp.ne.s32.totalorder %s1179_s23, %s1804_s24  ;;  %p1809_p0 = scmp.lt.s32.totalorder %s1179_s23, %s2399_s4 }
 0x1b6   : > { %p1810_p2 = scmp.lt.s32.totalorder %s1808_s1, %s1804_s24 }
 0x1b7   : > { %p1806_p8 = pnand %p1805_p10, %p2018_p9 }
 0x1b8   : > { %p1811_p12 = por %p1810_p2, %p1809_p0 }
 0x1b9   : > { %p1807_p13 = pneg %p1806_p8 }
 0x1bb   : > { %p1812_p6 = pnand %p1811_p12, %p1807_p13 }
 0x1bd   : > { %1815 = shalt.err (!%p1812_p6)
}
 0x1be   : > { %1532 = dma.vmem_to_hbm [thread:$0]  (%p2018_p9), %s1182_s15, 128, %s1179_s23, %s1160_s29  }
 0x1bf   : > { %s1925_s7 = smov [#allocation14]   ;;  %p2426_p3 = scmp.eq.s32.totalorder %s1992_s27, 3 }
 0x1c0   : > { %s1210_s12 = sshll.u32 %s1925_s7, 4  ;;  %s1211_s12 = int_to_ptr.vmem [resolvable:$true] %s1210_s12 }
 0x1c1   : > { %s1816_s16 = scalar_lea.vmem %s1211_s12, 32  ;;  %p1823_p7 = scmp.lt.s32.totalorder %s1211_s12, %s1211_s12 }
 0x1c2   : > { %p1817_p1 = scmp.ne.s32.totalorder %s1211_s12, %s1816_s16  ;;  %p1824_p10 = scmp.lt.s32.totalorder %s1816_s16, %s1816_s16 }
 0x1c4   : > { %p1818_p4 = pnand %p1817_p1, %p2426_p3  ;;  %p1825_p8 = por %p1824_p10, %p1823_p7 }
 0x1c6   : > { %p1819_p5 = pneg %p1818_p4 }
 0x1c8   : > { %p1826_p11 = pnand %p1825_p8, %p1819_p5 }
 0x1ca   : > { %1829 = shalt.err (!%p1826_p11)
}
 0x1cb   : > { %p2427_p13 = pmov %p2426_p3  ;;  %p2428_p9 = pmov %p2426_p3 }
 0x1cd   : > { %1535 = dma.vmem_to_hbm [thread:$0]  (%p2427_p13), %s1211_s12, 32, %s2401_s6, [#allocation13]  }
 0x1ce   : > { %1877 = dma.done.wait (%p2428_p9), [#allocation13], 32   ;;  %p2429_p0 = pmov %p2426_p3 }
 0x1d0   : > { %1879 = vsyncadd (%p2429_p0), [#allocation13], 4294967264 }
 0x1d1 PF: > { %s2430_s10 = sld [smem:[#allocation23_spill]] }
 0x1d2   : > { %s2431_s19 = sld [smem:[#allocation21_spill]] }
 0x1d3   : > { %s2432_s30 = sld [smem:[#allocation26_spill]] }
 0x1d7   : > { %p1563_p2 = scmp.ge.s32.totalorder %s2430_s10, 2 }
 0x1d8   : > { %s1226_s20 = sand.u32 1, %s2431_s19  }
 0x1d9   : > { %p2433_p12 = scmp.ne.s32.totalorder %s2432_s30, 0  ;;  %s1227_s9 = scalar_lea.sflag [#allocation5], %s1226_s20 }
 0x1db   : > { %p1554_p11 = pnand %p1563_p2, %p2433_p12 }
 0x1dd   : > { %p1555_p6 = pneg %p1554_p11 }
 0x1df   : > { %1881 = dma.done.wait (%p1555_p6), %s1227_s9, 128  }
 0x1e0   : > { %1883 = vsyncadd (%p1555_p6), %s1227_s9, 4294967168  ;;  %s2434_s23 = sadd.s32 4294967294, %s2430_s10  }
 0x1e1   : > { %s1235_s15 = sand.u32 1, %s2434_s23  }
 0x1e2   : > { %s1236_s29 = scalar_lea.sflag [#allocation13], %s1235_s15 }
 0x1e3   : > { %1885 = dma.done.wait (%p1555_p6), %s1236_s29, 128  }
 0x1e4   : > { %1887 = vsyncadd (%p1555_p6), %s1236_s29, 4294967168  ;;  %s32_s26 = sadd.s32 1, %s2430_s10   ;;  %s2435_s27 = sld [smem:[#allocation22_spill]] }
 0x1e5   : > { %p29_p1 = scmp.ge.s32.totalorder %s32_s26, 6   ;;  %s2436_s23 = sld [smem:[#allocation25_spill]] }
 0x1e6   : > { %s2437_s14 = sld [smem:[#allocation24_spill]]  ;;  %s2438_s21 = smov %s1894_s22 }
 0x1e7   : > { %s2440_s24 = smov %s1906_s25 }
 0x1e8   :  { %31 = sbr.rel (!%p29_p1) target bundleno = 15 (0xf), region = 152 }
 0x1ea   : > { %s2439_s22 = smov %s2435_s27 }
 0x1ec   : > { %s2441_s25 = smov %s2437_s14 }
 0x1ed   :  { %1241 = vsyncpa [#allocation4], 1 }
 0x1ee   :  { %1243 = vsyncpa [#allocation4 + $0x1], 1 }
 0x1ef   :  { %1244 = vsyncpa [#allocation7], 1 }
 0x1f0   :  { %1246 = vsyncpa [#allocation7 + $0x1], 1 }
 0x1f1   :  { %1247 = vsyncpa [#allocation10], 1 }
 0x1f2   :  { %1249 = vsyncpa [#allocation10 + $0x1], 1 }
 0x1f3   :  { %1250 = vsyncpa [#allocation5], 1 }
 0x1f4   :  { %1252 = vsyncpa [#allocation5 + $0x1], 1 }
 0x1f5   :  { %1253 = vsyncpa [#allocation13], 1 }
 0x1f6   :  { %1255 = vsyncpa [#allocation13 + $0x1], 1 }

</bundles_post_ra>
